<compile_context>
chip_gen: v5e
topology: v5e:2x2
jax: 0.10.0
libtpu: 0.0.40
codegen_flags: <defaults>
</compile_context>

<pallas_src>
import jax
import jax.numpy as jnp
from jax.experimental import pallas as pl
from jax.experimental.pallas import tpu as pltpu


_LANE = 128   # vreg lane width
_SUB = 8      # f32 sublane count


def _round_up(x, m):
    return ((x + m - 1) // m) * m


def _mlp_kernel(x_ref, w1_ref, b1_ref, w2_ref, b2_ref, o_ref):
    # Fused 2-layer MLP head on one batch tile:
    #   out = relu(x @ W1 + b1) @ W2 + b2
    # x arrives f32 and is cast to bf16 on the VPU right before the MXU
    # (hides under the matmul); accumulation and bias adds stay f32.
    x = x_ref[...].astype(jnp.bfloat16)                        # [TB, H]
    h = jnp.dot(x, w1_ref[...], preferred_element_type=jnp.float32)
    h = jnp.maximum(h + b1_ref[...], 0.0)                      # [TB, Mp] f32
    y = jnp.dot(h.astype(jnp.bfloat16), w2_ref[...],
                preferred_element_type=jnp.float32)
    o_ref[...] = (y + b2_ref[...]).astype(o_ref.dtype)         # [TB, Cp]


def prepare_params(params):
    """One-time (outside the per-step path) pad + cast of the head params.

    M (hidden) is padded to 128 lanes; C (classes) to 128, or 256 when
    C > 128 so the second matmul fills the 256-wide MXU on v6e/v7x.
    Matmul operands go to bf16, biases stay f32.  Zero padding keeps the
    math exact (padded hidden lanes are relu(0+0)=0, padded W2 rows are 0).
    """
    w1 = jnp.asarray(params["w1"], jnp.float32)
    w2 = jnp.asarray(params["w2"], jnp.float32)
    b1 = jnp.asarray(params["b1"], jnp.float32).reshape(1, -1)
    b2 = jnp.asarray(params["b2"], jnp.float32).reshape(1, -1)
    H, M = w1.shape
    C = w2.shape[1]
    Mp = _round_up(M, _LANE)
    Cp = _round_up(C, 2 * _LANE if C > _LANE else _LANE)
    return {
        "w1": jnp.pad(w1, ((0, 0), (0, Mp - M))).astype(jnp.bfloat16),
        "b1": jnp.pad(b1, ((0, 0), (0, Mp - M))),
        "w2": jnp.pad(w2, ((0, Mp - M), (0, Cp - C))).astype(jnp.bfloat16),
        "b2": jnp.pad(b2, ((0, 0), (0, Cp - C))),
        "num_classes": int(C),
        "hidden": int(H),
    }


def _choose_batch_tiling(B, block_b):
    """Return (tile_rows, num_steps)."""
    block_b = max(_SUB, _round_up(block_b, _SUB))
    if B <= block_b:
        # Single grid step: no per-step overhead, largest MXU M dimension.
        return _round_up(B, _SUB), 1
    steps = pl.cdiv(B, block_b)
    if steps % 2:
        steps += 1            # even split across v7x's two TensorCores
    return _round_up(pl.cdiv(B, steps), _SUB), steps


def _vmem_limit_bytes(tb, H, Mp, Cp):
    weights = H * Mp * 2 + Mp * 4 + Mp * Cp * 2 + Cp * 4      # single-buffered
    tiles = 2 * tb * H * 4 + 2 * tb * Cp * 4                  # double-buffered x / out
    interm = tb * H * 2 + tb * Mp * 4 + tb * Mp * 2 + tb * Cp * 4
    # 2x on weights covers the double-buffer fallback; 1.5x + 2 MiB headroom.
    limit = int(1.5 * (2 * weights + tiles + interm)) + (2 << 20)
    return max(4 << 20, min(limit, 64 << 20))


def _build_head(Bp, tb, steps, H, Mp, Cp, *, single_buffer_weights, vmem_limit):
    # Constant-index weight/bias blocks: resident across steps; single-buffer
    # them (pl.Buffered(1)) so they don't eat VMEM twice.
    wkw = {"pipeline_mode": pl.Buffered(1)} if single_buffer_weights else {}
    in_specs = [
        pl.BlockSpec((tb, H), lambda i: (i, 0)),               # streamed batch tile (f32)
        pl.BlockSpec((H, Mp), lambda i: (0, 0), **wkw),        # W1 (bf16, resident)
        pl.BlockSpec((1, Mp), lambda i: (0, 0), **wkw),        # b1 (f32, resident)
        pl.BlockSpec((Mp, Cp), lambda i: (0, 0), **wkw),       # W2 (bf16, resident)
        pl.BlockSpec((1, Cp), lambda i: (0, 0), **wkw),        # b2 (f32, resident)
    ]
    cost = pl.CostEstimate(
        flops=2 * Bp * (H * Mp + Mp * Cp),
        transcendentals=0,
        bytes_accessed=(Bp * H * 4 + H * Mp * 2 + Mp * 4
                        + Mp * Cp * 2 + Cp * 4 + Bp * Cp * 4),
    )
    return pl.pallas_call(
        _mlp_kernel,
        out_shape=jax.ShapeDtypeStruct((Bp, Cp), jnp.float32),
        grid_spec=pltpu.PrefetchScalarGridSpec(
            num_scalar_prefetch=0,
            grid=(steps,),
            in_specs=in_specs,
            out_specs=pl.BlockSpec((tb, Cp), lambda i: (i, 0)),
        ),
        compiler_params=pltpu.CompilerParams(
            # Batch axis is independent -> shard across v7x's 2 TensorCores.
            dimension_semantics=("parallel",),
            vmem_limit_bytes=vmem_limit,
        ),
        cost_estimate=cost,
    )


def classifier_forward(data, prepared, *, block_b=256):
    """Mirrors Classifier.forward on pooled features: logits = MLP(text)."""
    text = data["text"]                                        # [B, H] f32
    w1, b1, w2, b2 = prepared["w1"], prepared["b1"], prepared["w2"], prepared["b2"]
    C = prepared["num_classes"]
    B, H = text.shape
    Mp = w1.shape[1]
    Cp = w2.shape[1]

    tb, steps = _choose_batch_tiling(B, block_b)
    Bp = tb * steps
    # Padded batch rows are wasted compute (not zero in the output) but are
    # sliced off below; results stay exact.
    x = text if Bp == B else jnp.pad(text, ((0, Bp - B), (0, 0)))

    vmem_limit = _vmem_limit_bytes(tb, H, Mp, Cp)
    try:
        out = _build_head(Bp, tb, steps, H, Mp, Cp,
                          single_buffer_weights=True,
                          vmem_limit=vmem_limit)(x, w1, b1, w2, b2)
    except Exception:
        # Fallback for jax/Mosaic builds that reject buffer_count=1: default
        # double-buffered weight blocks (correctness identical).
        out = _build_head(Bp, tb, steps, H, Mp, Cp,
                          single_buffer_weights=False,
                          vmem_limit=vmem_limit)(x, w1, b1, w2, b2)

    # Drop batch / class padding before returning logits (f32, like the
    # PyTorch head).
    return out[:B, :C]


def init_params(key, hidden, mid, num_classes):
    k1, k2, k3, k4 = jax.random.split(key, 4)
    scale1 = 1.0 / jnp.sqrt(hidden)
    scale2 = 1.0 / jnp.sqrt(mid)
    return {
        "w1": jax.random.normal(k1, (hidden, mid), jnp.float32) * scale1,
        "b1": jax.random.normal(k2, (1, mid), jnp.float32) * 0.01,
        "w2": jax.random.normal(k3, (mid, num_classes), jnp.float32) * scale2,
        "b2": jax.random.normal(k4, (1, num_classes), jnp.float32) * 0.01,
    }


if __name__ == "__main__":
    # Small shapes: batch=16, pooled hidden=128, mlp mid=64, classes=8.
    B, H, M, C = 16, 128, 64, 8
    key = jax.random.PRNGKey(0)
    k_x, k_p = jax.random.split(key)

    text_features = jax.random.normal(k_x, (B, H), jnp.float32)
    params = init_params(k_p, H, M, C)
    prepared = prepare_params(params)          # one-time pad/cast of weights
    data = {"text": text_features}

    # Reference in plain JAX with the same bf16-input / f32-accumulate math.
    f32 = jnp.float32
    xq = text_features.astype(jnp.bfloat16).astype(f32)
    w1q = params["w1"].astype(jnp.bfloat16).astype(f32)
    w2q = params["w2"].astype(jnp.bfloat16).astype(f32)
    h_ref = jnp.maximum(
        jnp.dot(xq, w1q, precision=jax.lax.Precision.HIGHEST) + params["b1"], 0.0)
    h_ref = h_ref.astype(jnp.bfloat16).astype(f32)
    ref = jnp.dot(h_ref, w2q, precision=jax.lax.Precision.HIGHEST) + params["b2"]

    # Single-block path (grid=(1,)) — the default for small batches.
    out_single = jax.block_until_ready(classifier_forward(data, prepared))
    # Tiled path (grid=(2,), even step count) — exercises the batch pipeline.
    out_tiled = jax.block_until_ready(classifier_forward(data, prepared, block_b=8))

    assert out_single.shape == (B, C)
    assert out_tiled.shape == (B, C)
    assert jnp.allclose(out_single, ref, atol=2e-3, rtol=2e-3)
    assert jnp.allclose(out_tiled, ref, atol=2e-3, rtol=2e-3)

    print("KERNEL_OK")
</pallas_src>

<mosaic_0001>
module attributes {stable_mosaic.version = 11 : i64} {
  func.func @_mlp_kernel(%arg0: i32, %arg1: memref<16x128xf32, #tpu.memory_space<vmem>>, %arg2: memref<128x128xbf16, #tpu.memory_space<vmem>>, %arg3: memref<1x128xf32, #tpu.memory_space<vmem>>, %arg4: memref<128x128xbf16, #tpu.memory_space<vmem>>, %arg5: memref<1x128xf32, #tpu.memory_space<vmem>>, %arg6: memref<16x128xf32, #tpu.memory_space<vmem>>) attributes {dimension_semantics = [#tpu.dimension_semantics<parallel>], iteration_bounds = array<i64: 1>, scalar_prefetch = 0 : i64, scratch_operands = 0 : i64, tpu.core_type = #tpu.core_type<tc>, window_params = [{transform_indices = @transform_0, window_bounds = array<i64: 16, 128>}, {pipeline_mode = #tpu.pipeline_mode<synchronous>, transform_indices = @transform_1, window_bounds = array<i64: 128, 128>}, {pipeline_mode = #tpu.pipeline_mode<synchronous>, transform_indices = @transform_2, window_bounds = array<i64: 1, 128>}, {pipeline_mode = #tpu.pipeline_mode<synchronous>, transform_indices = @transform_3, window_bounds = array<i64: 128, 128>}, {pipeline_mode = #tpu.pipeline_mode<synchronous>, transform_indices = @transform_4, window_bounds = array<i64: 1, 128>}, {transform_indices = @transform_5, window_bounds = array<i64: 16, 128>}]} {
    %c0 = arith.constant 0 : index
    %c0_0 = arith.constant 0 : index
    %0 = vector.load %arg1[%c0, %c0_0] : memref<16x128xf32, #tpu.memory_space<vmem>>, vector<16x128xf32>
    %1 = arith.truncf %0 : vector<16x128xf32> to vector<16x128xbf16>
    %c0_1 = arith.constant 0 : index
    %c0_2 = arith.constant 0 : index
    %2 = vector.load %arg2[%c0_1, %c0_2] : memref<128x128xbf16, #tpu.memory_space<vmem>>, vector<128x128xbf16>
    %cst = arith.constant dense<0.000000e+00> : vector<16x128xf32>
    %3 = tpu.matmul %1, %2, %cst {dimension_numbers = #tpu.dot_dimension_numbers<[1], [0], [0], [1], [0, 0, 1, 1], [], []>} : vector<16x128xbf16>, vector<128x128xbf16>, vector<16x128xf32> -> vector<16x128xf32>
    %c0_3 = arith.constant 0 : index
    %c0_4 = arith.constant 0 : index
    %4 = vector.load %arg3[%c0_3, %c0_4] : memref<1x128xf32, #tpu.memory_space<vmem>>, vector<1x128xf32>
    %5 = vector.broadcast %4 : vector<1x128xf32> to vector<16x128xf32>
    %6 = arith.addf %3, %5 : vector<16x128xf32>
    %cst_5 = arith.constant 0.000000e+00 : f32
    %7 = vector.broadcast %cst_5 : f32 to vector<16x128xf32>
    %8 = arith.maximumf %6, %7 : vector<16x128xf32>
    %9 = arith.truncf %8 : vector<16x128xf32> to vector<16x128xbf16>
    %c0_6 = arith.constant 0 : index
    %c0_7 = arith.constant 0 : index
    %10 = vector.load %arg4[%c0_6, %c0_7] : memref<128x128xbf16, #tpu.memory_space<vmem>>, vector<128x128xbf16>
    %cst_8 = arith.constant dense<0.000000e+00> : vector<16x128xf32>
    %11 = tpu.matmul %9, %10, %cst_8 {dimension_numbers = #tpu.dot_dimension_numbers<[1], [0], [0], [1], [0, 0, 1, 1], [], []>} : vector<16x128xbf16>, vector<128x128xbf16>, vector<16x128xf32> -> vector<16x128xf32>
    %c0_9 = arith.constant 0 : index
    %c0_10 = arith.constant 0 : index
    %12 = vector.load %arg5[%c0_9, %c0_10] : memref<1x128xf32, #tpu.memory_space<vmem>>, vector<1x128xf32>
    %13 = vector.broadcast %12 : vector<1x128xf32> to vector<16x128xf32>
    %14 = arith.addf %11, %13 : vector<16x128xf32>
    %c0_11 = arith.constant 0 : index
    %c0_12 = arith.constant 0 : index
    %15 = vector.load %arg6[%c0_11, %c0_12] : memref<16x128xf32, #tpu.memory_space<vmem>>, vector<16x128xf32>
    tpu.vector_store %arg6[%c0_11, %c0_12], %14 {strides = array<i32>} : memref<16x128xf32, #tpu.memory_space<vmem>>, vector<16x128xf32>,
    return
  }
  func.func @transform_0(%arg0: i32) -> (i32, i32) {
    %c0_i32 = arith.constant 0 : i32
    %c0_i32_0 = arith.constant 0 : i32
    return %arg0, %c0_i32 : i32, i32
  }
  func.func @transform_1(%arg0: i32) -> (i32, i32) {
    %c0_i32 = arith.constant 0 : i32
    %c0_i32_0 = arith.constant 0 : i32
    %c0_i32_1 = arith.constant 0 : i32
    return %c0_i32, %c0_i32_0 : i32, i32
  }
  func.func @transform_2(%arg0: i32) -> (i32, i32) {
    %c0_i32 = arith.constant 0 : i32
    %c0_i32_0 = arith.constant 0 : i32
    %c0_i32_1 = arith.constant 0 : i32
    return %c0_i32, %c0_i32_0 : i32, i32
  }
  func.func @transform_3(%arg0: i32) -> (i32, i32) {
    %c0_i32 = arith.constant 0 : i32
    %c0_i32_0 = arith.constant 0 : i32
    %c0_i32_1 = arith.constant 0 : i32
    return %c0_i32, %c0_i32_0 : i32, i32
  }
  func.func @transform_4(%arg0: i32) -> (i32, i32) {
    %c0_i32 = arith.constant 0 : i32
    %c0_i32_0 = arith.constant 0 : i32
    %c0_i32_1 = arith.constant 0 : i32
    return %c0_i32, %c0_i32_0 : i32, i32
  }
  func.func @transform_5(%arg0: i32) -> (i32, i32) {
    %c0_i32 = arith.constant 0 : i32
    %c0_i32_0 = arith.constant 0 : i32
    return %arg0, %c0_i32 : i32, i32
  }
}

module attributes {stable_mosaic.version = 11 : i64} {
  func.func @_mlp_kernel(%arg0: i32, %arg1: memref<16x128xf32, #tpu.memory_space<vmem>>, %arg2: memref<128x128xbf16, #tpu.memory_space<vmem>>, %arg3: memref<1x128xf32, #tpu.memory_space<vmem>>, %arg4: memref<128x128xbf16, #tpu.memory_space<vmem>>, %arg5: memref<1x128xf32, #tpu.memory_space<vmem>>, %arg6: memref<16x128xf32, #tpu.memory_space<vmem>>) attributes {dimension_semantics = [#tpu.dimension_semantics<parallel>], iteration_bounds = array<i64: 1>, scalar_prefetch = 0 : i64, scratch_operands = 0 : i64, tpu.core_type = #tpu.core_type<tc>, window_params = [{transform_indices = @transform_0, window_bounds = array<i64: 16, 128>}, {pipeline_mode = #tpu.pipeline_mode<synchronous>, transform_indices = @transform_1, window_bounds = array<i64: 128, 128>}, {pipeline_mode = #tpu.pipeline_mode<synchronous>, transform_indices = @transform_2, window_bounds = array<i64: 1, 128>}, {pipeline_mode = #tpu.pipeline_mode<synchronous>, transform_indices = @transform_3, window_bounds = array<i64: 128, 128>}, {pipeline_mode = #tpu.pipeline_mode<synchronous>, transform_indices = @transform_4, window_bounds = array<i64: 1, 128>}, {transform_indices = @transform_5, window_bounds = array<i64: 16, 128>}]} {
    %c0 = arith.constant 0 : index
    %c0_0 = arith.constant 0 : index
    %0 = vector.load %arg1[%c0, %c0_0] : memref<16x128xf32, #tpu.memory_space<vmem>>, vector<16x128xf32>
    %1 = arith.truncf %0 : vector<16x128xf32> to vector<16x128xbf16>
    %c0_1 = arith.constant 0 : index
    %c0_2 = arith.constant 0 : index
    %2 = vector.load %arg2[%c0_1, %c0_2] : memref<128x128xbf16, #tpu.memory_space<vmem>>, vector<128x128xbf16>
    %cst = arith.constant dense<0.000000e+00> : vector<16x128xf32>
    %3 = tpu.matmul %1, %2, %cst {dimension_numbers = #tpu.dot_dimension_numbers<[1], [0], [0], [1], [0, 0, 1, 1], [], []>} : vector<16x128xbf16>, vector<128x128xbf16>, vector<16x128xf32> -> vector<16x128xf32>
    %c0_3 = arith.constant 0 : index
    %c0_4 = arith.constant 0 : index
    %4 = vector.load %arg3[%c0_3, %c0_4] : memref<1x128xf32, #tpu.memory_space<vmem>>, vector<1x128xf32>
    %5 = vector.broadcast %4 : vector<1x128xf32> to vector<16x128xf32>
    %6 = arith.addf %3, %5 : vector<16x128xf32>
    %cst_5 = arith.constant 0.000000e+00 : f32
    %7 = vector.broadcast %cst_5 : f32 to vector<16x128xf32>
    %8 = arith.maximumf %6, %7 : vector<16x128xf32>
    %9 = arith.truncf %8 : vector<16x128xf32> to vector<16x128xbf16>
    %c0_6 = arith.constant 0 : index
    %c0_7 = arith.constant 0 : index
    %10 = vector.load %arg4[%c0_6, %c0_7] : memref<128x128xbf16, #tpu.memory_space<vmem>>, vector<128x128xbf16>
    %cst_8 = arith.constant dense<0.000000e+00> : vector<16x128xf32>
    %11 = tpu.matmul %9, %10, %cst_8 {dimension_numbers = #tpu.dot_dimension_numbers<[1], [0], [0], [1], [0, 0, 1, 1], [], []>} : vector<16x128xbf16>, vector<128x128xbf16>, vector<16x128xf32> -> vector<16x128xf32>
    %c0_9 = arith.constant 0 : index
    %c0_10 = arith.constant 0 : index
    %12 = vector.load %arg5[%c0_9, %c0_10] : memref<1x128xf32, #tpu.memory_space<vmem>>, vector<1x128xf32>
    %13 = vector.broadcast %12 : vector<1x128xf32> to vector<16x128xf32>
    %14 = arith.addf %11, %13 : vector<16x128xf32>
    %c0_11 = arith.constant 0 : index
    %c0_12 = arith.constant 0 : index
    %15 = vector.load %arg6[%c0_11, %c0_12] : memref<16x128xf32, #tpu.memory_space<vmem>>, vector<16x128xf32>
    tpu.vector_store %arg6[%c0_11, %c0_12], %14 {strides = array<i32>} : memref<16x128xf32, #tpu.memory_space<vmem>>, vector<16x128xf32>,
    return
  }
  func.func @transform_0(%arg0: i32) -> (i32, i32) {
    %c0_i32 = arith.constant 0 : i32
    %c0_i32_0 = arith.constant 0 : i32
    return %arg0, %c0_i32 : i32, i32
  }
  func.func @transform_1(%arg0: i32) -> (i32, i32) {
    %c0_i32 = arith.constant 0 : i32
    %c0_i32_0 = arith.constant 0 : i32
    %c0_i32_1 = arith.constant 0 : i32
    return %c0_i32, %c0_i32_0 : i32, i32
  }
  func.func @transform_2(%arg0: i32) -> (i32, i32) {
    %c0_i32 = arith.constant 0 : i32
    %c0_i32_0 = arith.constant 0 : i32
    %c0_i32_1 = arith.constant 0 : i32
    return %c0_i32, %c0_i32_0 : i32, i32
  }
  func.func @transform_3(%arg0: i32) -> (i32, i32) {
    %c0_i32 = arith.constant 0 : i32
    %c0_i32_0 = arith.constant 0 : i32
    %c0_i32_1 = arith.constant 0 : i32
    return %c0_i32, %c0_i32_0 : i32, i32
  }
  func.func @transform_4(%arg0: i32) -> (i32, i32) {
    %c0_i32 = arith.constant 0 : i32
    %c0_i32_0 = arith.constant 0 : i32
    %c0_i32_1 = arith.constant 0 : i32
    return %c0_i32, %c0_i32_0 : i32, i32
  }
  func.func @transform_5(%arg0: i32) -> (i32, i32) {
    %c0_i32 = arith.constant 0 : i32
    %c0_i32_0 = arith.constant 0 : i32
    return %arg0, %c0_i32 : i32, i32
  }
}

</mosaic_0001>

<bundles_post_ra>
// kernel: tpu_custom_call.1
= control target key start
LH: loop header
LB: loop body
LE: loop exit
PB: predicated region body
PF: predicated region fallthrough
CT: control target
= control target key end

     0   :  { %10 = vsyncpa [#allocation3], 0  ;;  %s514_s0 = inlined_call_operand.hbm [shape: f32[16,128], index: 0, kind: input, shape index: {}]   ;;  %s515_s1 = inlined_call_operand.hbm [shape: bf16[128,128], index: 1, kind: input, shape index: {}]   ;;  %s516_s2 = inlined_call_operand.vmem [shape: f32[1,128], index: 2, kind: input, shape index: {}]   ;;  %s517_s3 = inlined_call_operand.hbm [shape: bf16[128,128], index: 3, kind: input, shape index: {}]   ;;  %s518_s4 = inlined_call_operand.vmem [shape: f32[1,128], index: 4, kind: input, shape index: {}]   ;;  %s519_s5 = inlined_call_operand.hbm [shape: f32[16,128], index: 5, kind: output, shape index: {}]  }
   0x1   :  { %11 = vsyncpa [#allocation6], 0  ;;  %s30_s20 = sshll.u32 %s515_s1, 4  ;;  %s31_s20 = int_to_ptr.hbm [resolvable:$true] %s30_s20 }
   0x2   :  { %12 = vsyncpa [#allocation4], 0  ;;  %s452_s21 = smov [#allocation5]   ;;  %s17_s25 = sshll.u32 %s514_s0, 4  ;;  %s18_s25 = int_to_ptr.hbm [resolvable:$true] %s17_s25 }
   0x3   :  { %s32_s22 = sshll.u32 %s452_s21, 4  ;;  %s453_s26 = smov 64   ;;  %s33_s22 = int_to_ptr.vmem [resolvable:$true] %s32_s22 }
   0x4   :  { %s454_s27 = smov 4   ;;  %s455_s28 = smov [#allocation2]  }
   0x5   :  { %38 = dma.hbm_to_vmem [thread:$0]  %s31_s20, 1024, %s33_s22, [#allocation6], %s453_s26, %s453_s26, %s454_s27  }
   0x6   :  { %s19_s29 = sshll.u32 %s455_s28, 4  ;;  %s456_s30 = smov 128   ;;  %s20_s29 = int_to_ptr.vmem [resolvable:$true] %s19_s29 }
   0x7   :  { %s457_s6 = smov 8   ;;  %s45_s8 = sshll.u32 %s517_s3, 4  ;;  %s46_s8 = int_to_ptr.hbm [resolvable:$true] %s45_s8 }
   0x8   :  { %25 = dma.hbm_to_vmem [thread:$0]  %s18_s25, 256, %s20_s29, [#allocation3], %s456_s30, %s456_s30, %s457_s6  }
   0x9   :  { %s458_s9 = smov [#allocation7]  }
   0xa   :  { %s47_s0 = sshll.u32 %s458_s9, 4  ;;  %s48_s0 = int_to_ptr.vmem [resolvable:$true] %s47_s0 }
   0xb   :  { %53 = dma.hbm_to_vmem [thread:$0]  %s46_s8, 1024, %s48_s0, [#allocation6], %s453_s26, %s453_s26, %s454_s27  }
   0xc   :  { %446 = dma.done.wait [#allocation3], 256  }
   0xd   :  { %447 = vsyncadd [#allocation3], 4294967040 }
   0xe   :  { %448 = dma.done.wait [#allocation6], 2048  }
   0xf   :  { %449 = vsyncadd [#allocation6], 4294965248  ;;  %v331_v0 = vld [vmem:[#allocation5 + $0x38] sm:$0xff]  ;;  %v330_v1 = vld [vmem:[#allocation5 + $0x30] sm:$0xff]  ;;  %s459_s13 = smov [#allocation8]  }
  0x10   :  { %139 = vmatpush.bf16.msra.mxu0 %v331_v0  ;;  %v339_v2 = vld [vmem:[#allocation7 + $0x38] sm:$0xff]  ;;  %v338_v3 = vld [vmem:[#allocation7 + $0x30] sm:$0xff]  ;;  %v329_v4 = vld [vmem:[#allocation5 + $0x28] sm:$0xff]  ;;  %s244_s14 = sshll.u32 %s459_s13, 4  ;;  %s245_s14 = int_to_ptr.vmem [resolvable:$true] %s244_s14 }
  0x11   :  { %224 = vmatpush.bf16.msra.mxu1 %v339_v2  ;;  %v337_v5 = vld [vmem:[#allocation7 + $0x28] sm:$0xff]  ;;  %v328_v6 = vld [vmem:[#allocation5 + $0x20] sm:$0xff]  ;;  %v327_v8 = vld [vmem:[#allocation5 + $0x18] sm:$0xff] }
  0x12   :  { %v336_v7 = vld [vmem:[#allocation7 + $0x20] sm:$0xff]  ;;  %v326_v9 = vld [vmem:[#allocation5 + $0x10] sm:$0xff]  ;;  %v325_v10 = vld [vmem:[#allocation5 + $0x8] sm:$0xff] }
  0x13   :  { %v324_v11 = vld [vmem:[#allocation5] sm:$0xff]  ;;  %v68_v12 = vld [vmem:[#allocation2] sm:$0xff]  ;;  %v69_v13 = vld [vmem:[#allocation2 + $0x8] sm:$0xff] }
  0x14   :  { %140 = vmatpush.bf16.msra.mxu0 %v330_v1  ;;  %v70_v14 = vpack.c.bf16 %v69_v13, %v68_v12  ;;  %v335_v15 = vld [vmem:[#allocation7 + $0x18] sm:$0xff]  ;;  %v334_v16 = vld [vmem:[#allocation7 + $0x10] sm:$0xff]  ;;  %v333_v17 = vld [vmem:[#allocation7 + $0x8] sm:$0xff] }
  0x15   :  { %225 = vmatpush.bf16.msra.mxu1 %v338_v3  ;;  %v332_v18 = vld [vmem:[#allocation7] sm:$0xff]  ;;  %v348_v20 = vld [vmem:[%s516_s2] ss:$0 sm:$0xff]  ;;  %s246_s2 = sshll.u32 %s519_s5, 4  ;;  %s247_s2 = int_to_ptr.hbm [resolvable:$true] %s246_s2 }
  0x16   :  { %v349_v27 = vld [vmem:[%s518_s4] ss:$0 sm:$0xff] }
  0x18   :  { %141 = vmatpush.bf16.msra.mxu0 %v329_v4 }
  0x19   :  { %226 = vmatpush.bf16.msra.mxu1 %v337_v5 }
  0x1c   :  { %142 = vmatpush.bf16.msra.mxu0 %v328_v6 }
  0x1d   :  { %227 = vmatpush.bf16.msra.mxu1 %v336_v7 }
  0x20   :  { %143 = vmatpush.bf16.msra.mxu0 %v327_v8 }
  0x21   :  { %228 = vmatpush.bf16.msra.mxu1 %v335_v15 }
  0x24   :  { %144 = vmatpush.bf16.msra.mxu0 %v326_v9 }
  0x25   :  { %229 = vmatpush.bf16.msra.mxu1 %v334_v16 }
  0x28   :  { %145 = vmatpush.bf16.msra.mxu0 %v325_v10 }
  0x29   :  { %230 = vmatpush.bf16.msra.mxu1 %v333_v17 }
  0x2c   :  { %146 = vmatpush.bf16.msra.mxu0 %v324_v11 }
  0x2d   :  { %231 = vmatpush.bf16.msra.mxu1 %v332_v18 }
  0x2f   :  { %147 = vmatmul.bf16.vlgmr.msra.gmra.mxu0 %v70_v14 }
  0xac   :  { %v148_v19 = vpop.f32.mrf.mxu0 }
  0xad   :  { %v149_v21 = vadd.f32 %v348_v20, %v148_v19 }
  0xaf   :  { %v153_v24 = vmax.f32 %v149_v21, 0.0 }
  0xb4   :  { %v150_v22 = vpop.f32.mrf.mxu0 }
  0xb5   :  { %v151_v23 = vadd.f32 %v348_v20, %v150_v22 }
  0xb7   :  { %v154_v25 = vmax.f32 %v151_v23, 0.0 }
  0xb9   :  { %v155_v26 = vpack.c.bf16 %v154_v25, %v153_v24 }
  0xbb   :  { %232 = vmatmul.bf16.vlgmr.msra.gmra.mxu1 %v155_v26 }
 0x138   :  { %v233_v28 = vpop.f32.mrf.mxu1 }
 0x139   :  { %v234_v29 = vadd.f32 %v349_v27, %v233_v28 }
 0x13b   :  { %238 = vst [vmem:[#allocation8] sm:$0xff] %v234_v29 }
 0x140   :  { %v235_v30 = vpop.f32.mrf.mxu1 }
 0x141   :  { %v236_v31 = vadd.f32 %v349_v27, %v235_v30 }
 0x143   :  { %239 = vst [vmem:[#allocation8 + $0x8] sm:$0xff] %v236_v31 }
 0x144   :  { %252 = dma.vmem_to_hbm [thread:$0]  %s245_s14, 256, %s247_s2, [#allocation4], %s456_s30, %s456_s30, %s457_s6  }
 0x145   :  { %450 = dma.done.wait [#allocation4], 256  }
 0x146   :  { %451 = vsyncadd [#allocation4], 4294967040 }
 0x147   :  { %257 = vsyncpa [#allocation3], 1 }
 0x148   :  { %258 = vsyncpa [#allocation6], 1 }
 0x149   :  { %259 = vsyncpa [#allocation4], 1 }

// kernel: tpu_custom_call.1
= control target key start
LH: loop header
LB: loop body
LE: loop exit
PB: predicated region body
PF: predicated region fallthrough
CT: control target
= control target key end

     0   :  { %10 = vsyncpa [#allocation3], 0  ;;  %s514_s0 = inlined_call_operand.hbm [shape: f32[16,128], index: 0, kind: input, shape index: {}]   ;;  %s515_s1 = inlined_call_operand.hbm [shape: bf16[128,128], index: 1, kind: input, shape index: {}]   ;;  %s516_s2 = inlined_call_operand.vmem [shape: f32[1,128], index: 2, kind: input, shape index: {}]   ;;  %s517_s3 = inlined_call_operand.hbm [shape: bf16[128,128], index: 3, kind: input, shape index: {}]   ;;  %s518_s4 = inlined_call_operand.vmem [shape: f32[1,128], index: 4, kind: input, shape index: {}]   ;;  %s519_s5 = inlined_call_operand.hbm [shape: f32[16,128], index: 5, kind: output, shape index: {}]  }
   0x1   :  { %11 = vsyncpa [#allocation6], 0  ;;  %s30_s20 = sshll.u32 %s515_s1, 4  ;;  %s31_s20 = int_to_ptr.hbm [resolvable:$true] %s30_s20 }
   0x2   :  { %12 = vsyncpa [#allocation4], 0  ;;  %s452_s21 = smov [#allocation5]   ;;  %s17_s25 = sshll.u32 %s514_s0, 4  ;;  %s18_s25 = int_to_ptr.hbm [resolvable:$true] %s17_s25 }
   0x3   :  { %s32_s22 = sshll.u32 %s452_s21, 4  ;;  %s453_s26 = smov 64   ;;  %s33_s22 = int_to_ptr.vmem [resolvable:$true] %s32_s22 }
   0x4   :  { %s454_s27 = smov 4   ;;  %s455_s28 = smov [#allocation2]  }
   0x5   :  { %38 = dma.hbm_to_vmem [thread:$0]  %s31_s20, 1024, %s33_s22, [#allocation6], %s453_s26, %s453_s26, %s454_s27  }
   0x6   :  { %s19_s29 = sshll.u32 %s455_s28, 4  ;;  %s456_s30 = smov 128   ;;  %s20_s29 = int_to_ptr.vmem [resolvable:$true] %s19_s29 }
   0x7   :  { %s457_s6 = smov 8   ;;  %s45_s8 = sshll.u32 %s517_s3, 4  ;;  %s46_s8 = int_to_ptr.hbm [resolvable:$true] %s45_s8 }
   0x8   :  { %25 = dma.hbm_to_vmem [thread:$0]  %s18_s25, 256, %s20_s29, [#allocation3], %s456_s30, %s456_s30, %s457_s6  }
   0x9   :  { %s458_s9 = smov [#allocation7]  }
   0xa   :  { %s47_s0 = sshll.u32 %s458_s9, 4  ;;  %s48_s0 = int_to_ptr.vmem [resolvable:$true] %s47_s0 }
   0xb   :  { %53 = dma.hbm_to_vmem [thread:$0]  %s46_s8, 1024, %s48_s0, [#allocation6], %s453_s26, %s453_s26, %s454_s27  }
   0xc   :  { %446 = dma.done.wait [#allocation3], 256  }
   0xd   :  { %447 = vsyncadd [#allocation3], 4294967040 }
   0xe   :  { %448 = dma.done.wait [#allocation6], 2048  }
   0xf   :  { %449 = vsyncadd [#allocation6], 4294965248  ;;  %v331_v0 = vld [vmem:[#allocation5 + $0x38] sm:$0xff]  ;;  %v330_v1 = vld [vmem:[#allocation5 + $0x30] sm:$0xff]  ;;  %s459_s13 = smov [#allocation8]  }
  0x10   :  { %139 = vmatpush.bf16.msra.mxu0 %v331_v0  ;;  %v339_v2 = vld [vmem:[#allocation7 + $0x38] sm:$0xff]  ;;  %v338_v3 = vld [vmem:[#allocation7 + $0x30] sm:$0xff]  ;;  %v329_v4 = vld [vmem:[#allocation5 + $0x28] sm:$0xff]  ;;  %s244_s14 = sshll.u32 %s459_s13, 4  ;;  %s245_s14 = int_to_ptr.vmem [resolvable:$true] %s244_s14 }
  0x11   :  { %224 = vmatpush.bf16.msra.mxu1 %v339_v2  ;;  %v337_v5 = vld [vmem:[#allocation7 + $0x28] sm:$0xff]  ;;  %v328_v6 = vld [vmem:[#allocation5 + $0x20] sm:$0xff]  ;;  %v327_v8 = vld [vmem:[#allocation5 + $0x18] sm:$0xff] }
  0x12   :  { %v336_v7 = vld [vmem:[#allocation7 + $0x20] sm:$0xff]  ;;  %v326_v9 = vld [vmem:[#allocation5 + $0x10] sm:$0xff]  ;;  %v325_v10 = vld [vmem:[#allocation5 + $0x8] sm:$0xff] }
  0x13   :  { %v324_v11 = vld [vmem:[#allocation5] sm:$0xff]  ;;  %v68_v12 = vld [vmem:[#allocation2] sm:$0xff]  ;;  %v69_v13 = vld [vmem:[#allocation2 + $0x8] sm:$0xff] }
  0x14   :  { %140 = vmatpush.bf16.msra.mxu0 %v330_v1  ;;  %v70_v14 = vpack.c.bf16 %v69_v13, %v68_v12  ;;  %v335_v15 = vld [vmem:[#allocation7 + $0x18] sm:$0xff]  ;;  %v334_v16 = vld [vmem:[#allocation7 + $0x10] sm:$0xff]  ;;  %v333_v17 = vld [vmem:[#allocation7 + $0x8] sm:$0xff] }
  0x15   :  { %225 = vmatpush.bf16.msra.mxu1 %v338_v3  ;;  %v332_v18 = vld [vmem:[#allocation7] sm:$0xff]  ;;  %v348_v20 = vld [vmem:[%s516_s2] ss:$0 sm:$0xff]  ;;  %s246_s2 = sshll.u32 %s519_s5, 4  ;;  %s247_s2 = int_to_ptr.hbm [resolvable:$true] %s246_s2 }
  0x16   :  { %v349_v27 = vld [vmem:[%s518_s4] ss:$0 sm:$0xff] }
  0x18   :  { %141 = vmatpush.bf16.msra.mxu0 %v329_v4 }
  0x19   :  { %226 = vmatpush.bf16.msra.mxu1 %v337_v5 }
  0x1c   :  { %142 = vmatpush.bf16.msra.mxu0 %v328_v6 }
  0x1d   :  { %227 = vmatpush.bf16.msra.mxu1 %v336_v7 }
  0x20   :  { %143 = vmatpush.bf16.msra.mxu0 %v327_v8 }
  0x21   :  { %228 = vmatpush.bf16.msra.mxu1 %v335_v15 }
  0x24   :  { %144 = vmatpush.bf16.msra.mxu0 %v326_v9 }
  0x25   :  { %229 = vmatpush.bf16.msra.mxu1 %v334_v16 }
  0x28   :  { %145 = vmatpush.bf16.msra.mxu0 %v325_v10 }
  0x29   :  { %230 = vmatpush.bf16.msra.mxu1 %v333_v17 }
  0x2c   :  { %146 = vmatpush.bf16.msra.mxu0 %v324_v11 }
  0x2d   :  { %231 = vmatpush.bf16.msra.mxu1 %v332_v18 }
  0x2f   :  { %147 = vmatmul.bf16.vlgmr.msra.gmra.mxu0 %v70_v14 }
  0xac   :  { %v148_v19 = vpop.f32.mrf.mxu0 }
  0xad   :  { %v149_v21 = vadd.f32 %v348_v20, %v148_v19 }
  0xaf   :  { %v153_v24 = vmax.f32 %v149_v21, 0.0 }
  0xb4   :  { %v150_v22 = vpop.f32.mrf.mxu0 }
  0xb5   :  { %v151_v23 = vadd.f32 %v348_v20, %v150_v22 }
  0xb7   :  { %v154_v25 = vmax.f32 %v151_v23, 0.0 }
  0xb9   :  { %v155_v26 = vpack.c.bf16 %v154_v25, %v153_v24 }
  0xbb   :  { %232 = vmatmul.bf16.vlgmr.msra.gmra.mxu1 %v155_v26 }
 0x138   :  { %v233_v28 = vpop.f32.mrf.mxu1 }
 0x139   :  { %v234_v29 = vadd.f32 %v349_v27, %v233_v28 }
 0x13b   :  { %238 = vst [vmem:[#allocation8] sm:$0xff] %v234_v29 }
 0x140   :  { %v235_v30 = vpop.f32.mrf.mxu1 }
 0x141   :  { %v236_v31 = vadd.f32 %v349_v27, %v235_v30 }
 0x143   :  { %239 = vst [vmem:[#allocation8 + $0x8] sm:$0xff] %v236_v31 }
 0x144   :  { %252 = dma.vmem_to_hbm [thread:$0]  %s245_s14, 256, %s247_s2, [#allocation4], %s456_s30, %s456_s30, %s457_s6  }
 0x145   :  { %450 = dma.done.wait [#allocation4], 256  }
 0x146   :  { %451 = vsyncadd [#allocation4], 4294967040 }
 0x147   :  { %257 = vsyncpa [#allocation3], 1 }
 0x148   :  { %258 = vsyncpa [#allocation6], 1 }
 0x149   :  { %259 = vsyncpa [#allocation4], 1 }

</bundles_post_ra>
